<compile_context>
chip_gen: v7x
topology: tpu7x:2x2x1
jax: 0.10.0
libtpu: 0.0.40
codegen_flags: <defaults>
</compile_context>

<pallas_src>
import functools

import jax
import jax.numpy as jnp
from jax.experimental import pallas as pl
from jax.experimental.pallas import tpu as pltpu


# ---------------------------------------------------------------------------
# Hardware-derived budgets
# ---------------------------------------------------------------------------
def _vmem_limit_bytes() -> int:
    """~75% of physical VMEM (v5e/v6e: ~96 MiB, v7x: ~48 MiB)."""
    try:
        cap = int(getattr(pltpu.get_tpu_info(), "vmem_capacity_bytes", 0) or 0)
    except Exception:  # hardware-info probe only -- never masks kernel errors
        cap = 0
    if cap <= 0:
        return 48 * 1024 * 1024
    return (cap // 4) * 3


def _pick_seq_block(t: int, *, big_vmem: bool) -> int:
    """Largest friendly sequence tile: the full length when small, otherwise
    the biggest 512/256/128-row block that divides it (512 only on 128 MiB
    VMEM parts; v7x caps at 256)."""
    cap = 512 if big_vmem else 256
    if t <= cap:
        return t
    for blk in ((512, 256, 128) if big_vmem else (256, 128)):
        if t % blk == 0:
            return blk
    return t  # fall back to un-tiled


# ---------------------------------------------------------------------------
# Linear (x @ W + b) kernel -- used for the K and V projections (run once)
# ---------------------------------------------------------------------------
def _linear_kernel(x_ref, w_ref, b_ref, o_ref):
    o_ref[0] = (jnp.dot(x_ref[0], w_ref[...],
                        preferred_element_type=jnp.float32)
                + b_ref[...]).astype(o_ref.dtype)


def _linear(x, w, b, *, block_t: int, vmem_limit: int):
    """x: (B, T, C_in) @ w: (C_in, C_out) + b: (1, C_out) -> (B, T, C_out)."""
    B, T, Cin = x.shape
    Cout = w.shape[1]
    return pl.pallas_call(
        _linear_kernel,
        out_shape=jax.ShapeDtypeStruct((B, T, Cout), x.dtype),
        grid_spec=pltpu.PrefetchScalarGridSpec(
            num_scalar_prefetch=0,
            grid=(B, T // block_t),
            in_specs=[
                pl.BlockSpec((1, block_t, Cin), lambda bi, ti: (bi, ti, 0)),
                pl.BlockSpec((Cin, Cout), lambda bi, ti: (0, 0)),
                pl.BlockSpec((1, Cout), lambda bi, ti: (0, 0)),
            ],
            out_specs=pl.BlockSpec((1, block_t, Cout), lambda bi, ti: (bi, ti, 0)),
        ),
        compiler_params=pltpu.CompilerParams(
            dimension_semantics=("parallel", "parallel"),
            vmem_limit_bytes=vmem_limit,
        ),
    )(x, w, b)


# ---------------------------------------------------------------------------
# Flash-style cross-attention kernel (q projection + attention + out proj)
# ---------------------------------------------------------------------------
def _flash_cross_attn_kernel(q_ref, kp_ref, vp_ref, wq_ref, bq_ref,
                             wc_ref, bc_ref, o_ref,
                             qp_ref, m_ref, l_ref, acc_ref,
                             *, n_heads: int, head_size: int):
    ki = pl.program_id(2)
    n_kv = pl.num_programs(2)
    cdt = kp_ref.dtype            # MXU operand dtype follows the activations

    @pl.when(ki == 0)
    def _init():
        # Project this q tile exactly once per (batch, q-tile).  The softmax
        # scale is folded into wq/bq host-side, so qp arrives pre-scaled.
        qp_ref[...] = (jnp.dot(q_ref[0], wq_ref[...],
                               preferred_element_type=jnp.float32)
                       + bq_ref[...]).astype(qp_ref.dtype)
        m_ref[...] = jnp.full_like(m_ref, -jnp.inf)
        l_ref[...] = jnp.zeros_like(l_ref)
        acc_ref[...] = jnp.zeros_like(acc_ref)

    qp = qp_ref[...]              # (tq, C), compute dtype, pre-scaled
    kp = kp_ref[0]                # (tkv_blk, C), already projected
    vp = vp_ref[0]                # (tkv_blk, C), already projected

    dn = (((1,), (1,)), ((), ()))     # contract last axes: q @ k^T, no k^T copy

    # Per-head flash (online-softmax) update; statically unrolled over heads.
    for h in range(n_heads):
        lo = h * head_size
        hi = lo + head_size
        s = jax.lax.dot_general(qp[:, lo:hi], kp[:, lo:hi], dn,
                                preferred_element_type=jnp.float32)  # (tq, tkv)
        m_prev = m_ref[:, h:h + 1]                                    # (tq, 1)
        m_new = jnp.maximum(m_prev, jnp.max(s, axis=-1, keepdims=True))
        alpha = jnp.exp(m_prev - m_new)
        p = jnp.exp(s - m_new)
        l_ref[:, h:h + 1] = alpha * l_ref[:, h:h + 1] + jnp.sum(
            p, axis=-1, keepdims=True)
        acc_ref[:, lo:hi] = alpha * acc_ref[:, lo:hi] + jnp.dot(
            p.astype(cdt), vp[:, lo:hi], preferred_element_type=jnp.float32)
        m_ref[:, h:h + 1] = m_new
        # TODO(synk): attn_dropout is identity in eval mode (no stochastic drop).

    @pl.when(ki == n_kv - 1)
    def _finalize():
        # Normalize each head (EUP reciprocal), then one C-wide out-projection.
        inv_l = pl.reciprocal(l_ref[...], approx=True)   # (tq, n_heads)
        for h in range(n_heads):
            lo = h * head_size
            hi = lo + head_size
            acc_ref[:, lo:hi] = acc_ref[:, lo:hi] * inv_l[:, h:h + 1]
        out = jnp.dot(acc_ref[...].astype(cdt), wc_ref[...],
                      preferred_element_type=jnp.float32) + bc_ref[...]
        # TODO(synk): resid_dropout is identity in eval mode.
        o_ref[0] = out.astype(o_ref.dtype)


# ---------------------------------------------------------------------------
# Public wrapper
# ---------------------------------------------------------------------------
def gpt2_cross_attention(q, k, v, params, *, n_heads: int):
    """q: (B, Tq, C); k, v: (B, Tkv, C).  Returns (B, Tq, C)."""
    B, Tq, C = q.shape
    _, Tkv, _ = k.shape
    assert C % n_heads == 0
    head_size = C // n_heads
    scale = head_size ** -0.5
    dt = q.dtype

    wq, bq, wk, bk, wv, bv, wc, bc = params
    # Weights / biases follow the activation dtype (keeps bf16 on the fast MXU
    # path); fold the 1/sqrt(head_size) scale into the q projection host-side.
    wq = (wq * scale).astype(dt)
    bq = (bq * scale).astype(dt)
    wk = wk.astype(dt)
    bk = bk.astype(dt)
    wv = wv.astype(dt)
    bv = bv.astype(dt)
    wc = wc.astype(dt)
    bc = bc.astype(dt)

    vmem_limit = _vmem_limit_bytes()
    big_vmem = vmem_limit >= 96 * 1024 * 1024
    tq_blk = _pick_seq_block(Tq, big_vmem=big_vmem)
    tkv_blk = _pick_seq_block(Tkv, big_vmem=big_vmem)

    # K / V projections run exactly once (never per q-tile).
    kp = _linear(k, wk, bk, block_t=tkv_blk, vmem_limit=vmem_limit)
    vp = _linear(v, wv, bv, block_t=tkv_blk, vmem_limit=vmem_limit)

    kernel = functools.partial(_flash_cross_attn_kernel,
                               n_heads=n_heads, head_size=head_size)

    return pl.pallas_call(
        kernel,
        out_shape=jax.ShapeDtypeStruct((B, Tq, C), dt),
        grid_spec=pltpu.PrefetchScalarGridSpec(
            num_scalar_prefetch=0,
            grid=(B, Tq // tq_blk, Tkv // tkv_blk),
            in_specs=[
                pl.BlockSpec((1, tq_blk, C), lambda b, qi, ki: (b, qi, 0)),   # q
                pl.BlockSpec((1, tkv_blk, C), lambda b, qi, ki: (b, ki, 0)),  # kp
                pl.BlockSpec((1, tkv_blk, C), lambda b, qi, ki: (b, ki, 0)),  # vp
                pl.BlockSpec((C, C), lambda b, qi, ki: (0, 0)),               # Wq
                pl.BlockSpec((1, C), lambda b, qi, ki: (0, 0)),               # bq
                pl.BlockSpec((C, C), lambda b, qi, ki: (0, 0)),               # Wc
                pl.BlockSpec((1, C), lambda b, qi, ki: (0, 0)),               # bc
            ],
            out_specs=pl.BlockSpec((1, tq_blk, C), lambda b, qi, ki: (b, qi, 0)),
            scratch_shapes=[
                pltpu.VMEM((tq_blk, C), dt),                  # projected q tile
                pltpu.VMEM((tq_blk, n_heads), jnp.float32),   # running max
                pltpu.VMEM((tq_blk, n_heads), jnp.float32),   # running sum
                pltpu.VMEM((tq_blk, C), jnp.float32),         # PV accumulator
            ],
        ),
        compiler_params=pltpu.CompilerParams(
            dimension_semantics=("parallel", "parallel", "arbitrary"),
            vmem_limit_bytes=vmem_limit,
        ),
    )(q, kp, vp, wq, bq, wc, bc)


# ---------------------------------------------------------------------------
# Params init + pure-JAX reference (eval-mode PyTorch forward)
# ---------------------------------------------------------------------------
def _init_params(key, embed_dim):
    """PyTorch-style init: Linear weights ~ N(0, 0.02), biases = 0.  Weights
    are stored pre-transposed as (C_in, C_out) so kernels compute x @ W + b
    (== torch's x @ W.T + b)."""
    keys = jax.random.split(key, 4)
    ws = [jax.random.normal(kk, (embed_dim, embed_dim), jnp.float32) * 0.02
          for kk in keys]
    bs = [jnp.zeros((1, embed_dim), jnp.float32) for _ in range(4)]
    # order: Wq, bq, Wk, bk, Wv, bv, Wc, bc
    return (ws[0], bs[0], ws[1], bs[1], ws[2], bs[2], ws[3], bs[3])


def _reference(q, k, v, params, *, n_heads):
    wq, bq, wk, bk, wv, bv, wc, bc = params
    B, Tq, C = q.shape
    Tkv = k.shape[1]
    hs = C // n_heads
    qp = q @ wq + bq
    kp = k @ wk + bk
    vp = v @ wv + bv
    qh = qp.reshape(B, Tq, n_heads, hs).transpose(0, 2, 1, 3)
    kh = kp.reshape(B, Tkv, n_heads, hs).transpose(0, 2, 1, 3)
    vh = vp.reshape(B, Tkv, n_heads, hs).transpose(0, 2, 1, 3)
    s = (qh @ kh.transpose(0, 1, 3, 2)) * (hs ** -0.5)
    p = jax.nn.softmax(s, axis=-1)
    a = p @ vh
    a = a.transpose(0, 2, 1, 3).reshape(B, Tq, C)
    return a @ wc + bc


if __name__ == "__main__":
    # config: embed_dim=32, num_heads=4, seq_len=8 (dropout = 0 / eval mode)
    B, Tq, Tkv, C, H = 2, 8, 8, 32, 4

    key = jax.random.PRNGKey(0)
    key_q, key_k, key_v, key_p = jax.random.split(key, 4)
    q_in = jax.random.normal(key_q, (B, Tq, C), jnp.float32)
    k_in = jax.random.normal(key_k, (B, Tkv, C), jnp.float32)
    v_in = jax.random.normal(key_v, (B, Tkv, C), jnp.float32)
    params = _init_params(key_p, C)

    out = gpt2_cross_attention(q_in, k_in, v_in, params, n_heads=H)
    out = jax.block_until_ready(out)

    ref = _reference(q_in, k_in, v_in, params, n_heads=H)
    assert out.shape == (B, Tq, C)
    # approx (EUP) reciprocal in the softmax normalization -> slightly relaxed tol
    assert jnp.allclose(out, ref, atol=2e-3, rtol=2e-3), "mismatch vs JAX reference"

    print("KERNEL_OK")
</pallas_src>

<mosaic_0001>
module attributes {stable_mosaic.version = 11 : i64} {
  func.func @_linear_kernel(%arg0: i32, %arg1: i32, %arg2: memref<1x8x32xf32, #tpu.memory_space<vmem>>, %arg3: memref<32x32xf32, #tpu.memory_space<vmem>>, %arg4: memref<1x32xf32, #tpu.memory_space<vmem>>, %arg5: memref<1x8x32xf32, #tpu.memory_space<vmem>>) attributes {dimension_semantics = [#tpu.dimension_semantics<parallel>, #tpu.dimension_semantics<parallel>], iteration_bounds = array<i64: 2, 1>, scalar_prefetch = 0 : i64, scratch_operands = 0 : i64, tpu.core_type = #tpu.core_type<tc>, window_params = [{transform_indices = @transform_0, window_bounds = array<i64: 1, 8, 32>}, {pipeline_mode = #tpu.pipeline_mode<synchronous>, transform_indices = @transform_1, window_bounds = array<i64: 32, 32>}, {pipeline_mode = #tpu.pipeline_mode<synchronous>, transform_indices = @transform_2, window_bounds = array<i64: 1, 32>}, {transform_indices = @transform_3, window_bounds = array<i64: 1, 8, 32>}]} {
    %c0 = arith.constant 0 : index
    %c0_0 = arith.constant 0 : index
    %c0_1 = arith.constant 0 : index
    %0 = vector.load %arg2[%c0, %c0_0, %c0_1] : memref<1x8x32xf32, #tpu.memory_space<vmem>>, vector<1x8x32xf32>
    %1 = vector.shape_cast %0 : vector<1x8x32xf32> to vector<8x32xf32>
    %c0_2 = arith.constant 0 : index
    %c0_3 = arith.constant 0 : index
    %2 = vector.load %arg3[%c0_2, %c0_3] : memref<32x32xf32, #tpu.memory_space<vmem>>, vector<32x32xf32>
    %cst = arith.constant dense<0.000000e+00> : vector<8x32xf32>
    %3 = tpu.matmul %1, %2, %cst {dimension_numbers = #tpu.dot_dimension_numbers<[1], [0], [0], [1], [0, 0, 1, 1], [], []>} : vector<8x32xf32>, vector<32x32xf32>, vector<8x32xf32> -> vector<8x32xf32>
    %c0_4 = arith.constant 0 : index
    %c0_5 = arith.constant 0 : index
    %4 = vector.load %arg4[%c0_4, %c0_5] : memref<1x32xf32, #tpu.memory_space<vmem>>, vector<1x32xf32>
    %5 = vector.broadcast %4 : vector<1x32xf32> to vector<8x32xf32>
    %6 = arith.addf %3, %5 : vector<8x32xf32>
    %c0_6 = arith.constant 0 : index
    %c0_7 = arith.constant 0 : index
    %c0_8 = arith.constant 0 : index
    %7 = vector.load %arg5[%c0_6, %c0_7, %c0_8] : memref<1x8x32xf32, #tpu.memory_space<vmem>>, vector<1x8x32xf32>
    %8 = vector.shape_cast %7 : vector<1x8x32xf32> to vector<8x32xf32>
    %9 = vector.shape_cast %6 : vector<8x32xf32> to vector<1x8x32xf32>
    tpu.vector_store %arg5[%c0_6, %c0_7, %c0_8], %9 {strides = array<i32>} : memref<1x8x32xf32, #tpu.memory_space<vmem>>, vector<1x8x32xf32>,
    return
  }
  func.func @transform_0(%arg0: i32, %arg1: i32) -> (i32, i32, i32) {
    %c0_i32 = arith.constant 0 : i32
    %c0_i32_0 = arith.constant 0 : i32
    return %arg0, %arg1, %c0_i32 : i32, i32, i32
  }
  func.func @transform_1(%arg0: i32, %arg1: i32) -> (i32, i32) {
    %c0_i32 = arith.constant 0 : i32
    %c0_i32_0 = arith.constant 0 : i32
    %c0_i32_1 = arith.constant 0 : i32
    return %c0_i32, %c0_i32_0 : i32, i32
  }
  func.func @transform_2(%arg0: i32, %arg1: i32) -> (i32, i32) {
    %c0_i32 = arith.constant 0 : i32
    %c0_i32_0 = arith.constant 0 : i32
    %c0_i32_1 = arith.constant 0 : i32
    return %c0_i32, %c0_i32_0 : i32, i32
  }
  func.func @transform_3(%arg0: i32, %arg1: i32) -> (i32, i32, i32) {
    %c0_i32 = arith.constant 0 : i32
    %c0_i32_0 = arith.constant 0 : i32
    return %arg0, %arg1, %c0_i32 : i32, i32, i32
  }
}

</mosaic_0001>

<bundles_post_ra>
// kernel: tpu_custom_call.1
= control target key start
LH: loop header
LB: loop body
LE: loop exit
PB: predicated region body
PF: predicated region fallthrough
CT: control target
= control target key end

     0   :  { %8 = vsyncpa [#allocation3], 0  ;;  %s918_s0 = inlined_call_operand.hbm [shape: f32[2,8,32], index: 0, kind: input, shape index: {}]   ;;  %s919_s1 = inlined_call_operand.hbm [shape: f32[32,32], index: 1, kind: input, shape index: {}]   ;;  %s920_s2 = inlined_call_operand.vmem [shape: f32[1,32], index: 2, kind: input, shape index: {}]   ;;  %s921_s3 = inlined_call_operand.hbm [shape: f32[2,8,32], index: 3, kind: output, shape index: {}]  }
   0x1   :  { %10 = vsyncpa [#allocation3 + $0x1], 0 }
   0x2   :  { %11 = vsyncpa [#allocation6], 0 }
   0x3   :  { %12 = vsyncpa [#allocation4], 0 }
   0x4   :  { %14 = vsyncpa [#allocation4 + $0x1], 0  ;;  %s701_s12 = smov 0   ;;  %s703_s13 = smov 0  }
   0x5   :  { %s705_s14 = smov 0   ;;  %s707_s15 = smov 0  }
   0x6   :  { %s709_s16 = smov 0   ;;  %s711_s17 = smov 0  }
   0x7 LB: > { %s410_s18 = sadd.s32 4294967295, %s671_s17   ;;  %s411_s19 = sadd.s32 4294967294, %s671_s17   ;;  %s671_s17 = sphi %s711_s17, %s20_s17   ;;  %s667_s16 = sphi %s709_s16, %s945_s16   ;;  %s663_s15 = sphi %s707_s15, %s944_s15   ;;  %s659_s14 = sphi %s705_s14, %s943_s14   ;;  %s655_s13 = sphi %s703_s13, %s942_s13   ;;  %s651_s12 = sphi %s701_s12, %s941_s12  }
   0x8   : > { %p54_p0 = scmp.ne.s32.totalorder %s655_s13, %s651_s12  ;;  %p735_p1 = scmp.eq.s32.totalorder %s410_s18, 0 }
   0x9   : > { %p739_p2 = scmp.eq.s32.totalorder %s410_s18, 1  ;;  %p128_p3 = scmp.eq.s32.totalorder %s411_s19, 1 }
   0xa   : > { %s926_s20 = scalar_select %p735_p1, 1, 0 }
   0xb   : > { %s927_s21 = scalar_select %p739_p2, 1, 0 }
   0xc   : > { %p745_p4 = por %p735_p1, %p54_p0  ;;  %p412_p5 = scmp.ge.s32.totalorder %s671_s17, 1 }
   0xd   : > { %p750_p6 = por %p128_p3, %p54_p0  ;;  %p135_p7 = scmp.lt.s32.totalorder %s671_s17, 3 }
   0xe   : > { %s928_s22 = scalar_select %p745_p4, 1, 0 }
   0xf   : > { %s929_s23 = scalar_select %p750_p6, 1, 0 }
  0x10   : > { %p755_p8 = pnand %p412_p5, %p135_p7  ;;  %s673_s25 = smov [#allocation5]  }
  0x11   : > { %s147_s26 = sshll.u32 %s673_s25, 4  ;;  %s32_s28 = sadd.s32 1, %s667_s16  ;;  %s148_s26 = int_to_ptr.vmem [resolvable:$true] %s147_s26 }
  0x12   : > { %s930_s24 = scalar_select %p755_p8, 1, 0 }
  0x13   : > { %p457_p9 = pneg %p755_p8  ;;  %s527_s4 = scalar_lea.hbm %s919_s1, 512 }
  0x14   : > { %p528_p12 = scmp.ne.s32.totalorder %s919_s1, %s527_s4  ;;  %p534_p5 = scmp.lt.u32.totalorder %s527_s4, %s919_s1 }
  0x15   : > { %p764_p11 = pnand %p457_p9, %p735_p1 }
  0x17   : > { %p529_p13 = pneg %p764_p11 }
  0x19   : > { %p530_p0 = pnand %p529_p13, %p528_p12 }
  0x1b   : > { %p531_p3 = pneg %p530_p0 }
  0x1d   : > { %p536_p7 = pnand %p534_p5, %p531_p3 }
  0x1f   : > { %539 = shalt.err (!%p536_p7)
}
  0x20   : > { %s540_s9 = scalar_lea.vmem %s148_s26, 512  ;;  %p548_p1 = scmp.lt.s32.totalorder %s148_s26, %s148_s26 }
  0x21   : > { %p541_p9 = scmp.ne.s32.totalorder %s148_s26, %s540_s9  ;;  %p549_p4 = scmp.lt.s32.totalorder %s540_s9, %s540_s9 }
  0x23   : > { %p543_p10 = pnand %p541_p9, %p529_p13  ;;  %p550_p8 = por %p549_p4, %p548_p1 }
  0x25   : > { %p544_p6 = pneg %p543_p10 }
  0x27   : > { %p551_p2 = pnand %p550_p8, %p544_p6 }
  0x29   : > { %554 = shalt.err (!%p551_p2)
}
  0x2a   : > { %s674_s10 = smov 128   ;;  %s675_s11 = smov 8  }
  0x2b   : > { %460 = dma.hbm_to_vmem [thread:$0]  (!%p764_p11), %s919_s1, 512, %s148_s26, [#allocation6], %s674_s10, %s674_s10, %s675_s11  }
  0x2c   : > { %p34_p1 = scmp.ge.s32.totalorder %s32_s28, 2  ;;  %s41_s25 = sadd.s32 1, %s659_s14 }
  0x2d   : > { %p48_p2 = scmp.ne.s32.totalorder %s659_s14, %s655_s13  ;;  %p49_p4 = scmp.eq.s32.totalorder %s671_s17, 0 }
  0x2e   : > { %s947_s28 = smov (%p34_p1, %s32_s28), 0  ;;  %p933_p8 = scmp.ne.s32.totalorder %s927_s21, 0 }
  0x2f   : > { %p791_p6 = por %p49_p4, %p48_p2  ;;  %s36_s27 = ssub.s32 %s667_s16, %s947_s28 }
  0x30   : > { %p797_p10 = por %p933_p8, %p48_p2  ;;  %p470_p12 = scmp.lt.s32.totalorder %s671_s17, 2 }
  0x31   : > { %p39_p11 = scmp.eq.s32.totalorder %s36_s27, 0  ;;  %s164_s26 = sand.u32 1, %s659_s14  }
  0x32   : > { %s415_s4 = sshll.u32 %s164_s26, 3  ;;  %s416_s6 = sshll.u32 %s667_s16, 7 }
  0x33   : > { %s806_s5 = scalar_select %p39_p11, %s659_s14, %s41_s25  }
  0x34   : > { %s812_s9 = scalar_lea.hbm %s918_s0, %s416_s6  ;;  %s168_s21 = scalar_lea.vmem [#allocation2], %s415_s4 }
  0x35   : > { %s176_s10 = sshll.u32 %s168_s21, 4  ;;  %p818_p13 = pnand %p470_p12, %p791_p6  ;;  %s814_s10 = int_to_ptr.vmem [resolvable:$true] %s176_s10 }
  0x36   : > { %s165_s18 = scalar_lea.sflag [#allocation3], %s164_s26  ;;  %s555_s19 = scalar_lea.hbm %s812_s9, 128 }
  0x37   : > { %p556_p0 = scmp.ne.s32.totalorder %s812_s9, %s555_s19  ;;  %p557_p3 = pneg %p818_p13 }
  0x38   : > { %s560_s4 = scalar_lea.hbm %s918_s0, 256  ;;  %p561_p9 = scmp.lt.u32.totalorder %s812_s9, %s918_s0 }
  0x39   : > { %p558_p5 = pnand %p557_p3, %p556_p0  ;;  %p562_p1 = scmp.lt.u32.totalorder %s560_s4, %s555_s19 }
  0x3a   : > { %p564_p4 = scmp.lt.u32.totalorder %s555_s19, %s812_s9 }
  0x3b   : > { %p559_p7 = pneg %p558_p5  ;;  %p563_p2 = por %p562_p1, %p561_p9 }
  0x3d   : > { %p565_p6 = por %p564_p4, %p563_p2 }
  0x3f   : > { %p566_p8 = pnand %p565_p6, %p559_p7 }
  0x41   : > { %569 = shalt.err (!%p566_p8)
}
  0x42   : > { %s570_s26 = scalar_lea.vmem %s814_s10, 128  ;;  %s676_s7 = smov [#allocation2]  }
  0x43   : > { %p571_p12 = scmp.ne.s32.totalorder %s814_s10, %s570_s26  ;;  %s575_s8 = sshll.u32 %s676_s7, 4  ;;  %s576_s8 = int_to_ptr.vmem [resolvable:$false] %s575_s8 }
  0x44   : > { %s577_s21 = scalar_lea.vmem %s576_s8, 256  ;;  %p578_p5 = scmp.lt.s32.totalorder %s814_s10, %s576_s8 }
  0x45   : > { %p573_p11 = pnand %p571_p12, %p557_p3  ;;  %p579_p9 = scmp.lt.s32.totalorder %s577_s21, %s570_s26 }
  0x47   : > { %p574_p0 = pneg %p573_p11  ;;  %p580_p1 = por %p579_p9, %p578_p5 }
  0x49   : > { %p581_p2 = pnand %p580_p1, %p574_p0 }
  0x4b   : > { %584 = shalt.err (!%p581_p2)
}
  0x4c   : > { %464 = dma.hbm_to_vmem [thread:$0]  (!%p818_p13), %s812_s9, 128, %s814_s10, %s165_s18  }
  0x4d   : > { %p936_p7 = scmp.ne.s32.totalorder %s930_s24, 0 }
  0x4e   : > { %s850_s19 = sand.u32 (!%p936_p7), 1, %s655_s13   ;;  %p937_p3 = scmp.ne.s32.totalorder (!%p936_p7), %s928_s22, 0 }
  0x4f   : > { %185 = sbr.rel (%p936_p7) target bundleno = 329 (0x149), region = 32  ;;  %s418_s25 = sshll.u32 (!%p936_p7), %s850_s19, 3 }
  0x50   : > { %s188_s27 = scalar_lea.sflag (!%p936_p7), [#allocation3], %s850_s19  ;;  %s191_s4 = scalar_lea.vmem (!%p936_p7), [#allocation2], %s418_s25 }
  0x56   : > { %638 = dma.done.wait (%p937_p3), %s188_s27, 128  }
  0x57   : > { %640 = vsyncadd (%p937_p3), %s188_s27, 4294967168  ;;  %p938_p4 = scmp.ne.s32.totalorder %s926_s20, 0 }
  0x59   : > { %642 = dma.done.wait (%p938_p4), [#allocation6], 512  }
  0x5a   : > { %644 = vsyncadd (%p938_p4), [#allocation6], 4294966784  ;;  %v677_v0 = vmov 0.0|0.0   ;;  %vm678_vm0 = vmmov 0   ;;  %v679_v1 = vmov 0.0   ;;  %v219_v2 = vld [vmem:[#allocation5] sm:$0xff] }
  0x5b   : > { %443 = vmatprep.subr.bf16.mxu0 %v677_v0  ;;  %440 = vmatprep.mubr.msk.f32.mxu0 %vm678_vm0, %v679_v1  ;;  %v220_v3 = vld [vmem:[#allocation5 + $0x8] sm:$0xff]  ;;  %v221_v4 = vld [vmem:[#allocation5 + $0x10] sm:$0xff]  ;;  %v222_v6 = vld [vmem:[#allocation5 + $0x18] sm:$0xff]  ;;  %vm230_vm1 = vcmask 261120   ;;  %s424_s24 = sshll.u32 %s663_s15, 7  ;;  %s217_s9 = scalar_lea.vmem [#allocation7], %s418_s25 }
  0x5c   : > { %v444_v5 = vpack.c.bf16 %v220_v3, %v219_v2  ;;  %v447_v7 = vpack.c.bf16 %v222_v6, %v221_v4  ;;  %v218_v8 = vld [vmem:[%s191_s4] sm:$0xff]  ;;  %s320_s10 = sshll.u32 %s217_s9, 4  ;;  %s869_s29 = scalar_lea.hbm %s921_s3, %s424_s24  ;;  %s871_s10 = int_to_ptr.vmem [resolvable:$true] %s320_s10 }
  0x5d   : > { %v421_v9 = vld [vmem:[%s920_s2] ss:$0 sm:$0xff]  ;;  %s306_s6 = scalar_lea.sflag [#allocation4], %s850_s19  ;;  %s585_s26 = scalar_lea.vmem %s871_s10, 128 }
  0x5e   : > { %445 = vmatpush3.bf16.msra.mxu0 %v444_v5  ;;  %p586_p13 = scmp.ne.s32.totalorder %s871_s10, %s585_s26  ;;  %s680_s15 = smov [#allocation7]  }
  0x5f   : > { %446 = vmatprep.subr.bf16.mxu0 %v677_v0  ;;  %s589_s7 = sshll.u32 %s680_s15, 4  ;;  %s590_s7 = int_to_ptr.vmem [resolvable:$false] %s589_s7 }
  0x60   : > { %p587_p6 = pnand %p586_p13, %p797_p10  ;;  %s591_s8 = scalar_lea.vmem %s590_s7, 256 }
  0x61   : > { %p592_p12 = scmp.lt.s32.totalorder %s871_s10, %s590_s7  ;;  %p593_p11 = scmp.lt.s32.totalorder %s591_s8, %s585_s26 }
  0x62   : > { %448 = vmatpush3.bf16.msra.mxu0 %v447_v7  ;;  %p588_p8 = pneg %p587_p6 }
  0x63   : > { %p594_p0 = por %p593_p11, %p592_p12 }
  0x65   : > { %441 = vmatmul.mubr.msk.f32.vlgmr.msra.gmra.mrb[0].mxu0 %vm230_vm1, %v218_v8  ;;  %p595_p5 = pnand %p594_p0, %p588_p8 }
 0x138   : > { %v300_v10 = vpop.f32.mrb[0].mxu0 }
 0x139   : > { %v301_v11 = vadd.f32 %v421_v9, %v300_v10  ;;  %v442_v12 = vpop.f32.mrb[1].mxu0 }
 0x13b   : > { %304 = vst.msk [vmem:[%s217_s9] sm:$0xff] %vm230_vm1, %v301_v11 }
 0x13c   : > { %598 = shalt.err (!%p595_p5)
}
 0x13d   : > { %s599_s21 = scalar_lea.hbm %s869_s29, 128  ;;  %s603_s27 = scalar_lea.hbm %s921_s3, 256 }
 0x13e   : > { %p600_p9 = scmp.ne.s32.totalorder %s869_s29, %s599_s21  ;;  %p604_p7 = scmp.lt.u32.totalorder %s869_s29, %s921_s3 }
 0x13f   : > { %p605_p3 = scmp.lt.u32.totalorder %s603_s27, %s599_s21  ;;  %p607_p13 = scmp.lt.u32.totalorder %s599_s21, %s869_s29 }
 0x140   : > { %p601_p1 = pnand %p600_p9, %p797_p10 }
 0x141   : > { %p606_p4 = por %p605_p3, %p604_p7 }
 0x142   : > { %p602_p2 = pneg %p601_p1 }
 0x143   : > { %p608_p6 = por %p607_p13, %p606_p4 }
 0x145   : > { %p609_p8 = pnand %p608_p6, %p602_p2 }
 0x147   : > { %612 = shalt.err (!%p609_p8)
}
 0x148   : > { %455 = dma.vmem_to_hbm [thread:$0]  (%p797_p10), %s871_s10, 128, %s869_s29, %s306_s6  }
 0x149 PF: > { %s332_s22 = sand.u32 1, %s651_s12   ;;  %p939_p12 = scmp.ne.s32.totalorder %s929_s23, 0 }
 0x14a   : > { %p940_p11 = scmp.ge.s32.totalorder %s671_s17, 2  ;;  %s333_s24 = scalar_lea.sflag [#allocation4], %s332_s22 }
 0x14c   : > { %p466_p0 = pnand %p940_p11, %p939_p12 }
 0x14e   : > { %646 = dma.done.wait (!%p466_p0), %s333_s24, 128  }
 0x14f   : > { %648 = vsyncadd (!%p466_p0), %s333_s24, 4294967168  ;;  %s20_s17 = sadd.s32 1, %s671_s17   ;;  %s941_s12 = smov %s655_s13 }
 0x150   : > { %p17_p5 = scmp.ge.s32.totalorder %s20_s17, 4   ;;  %s942_s13 = smov %s659_s14 }
 0x151   : > { %s943_s14 = smov %s806_s5  ;;  %s944_s15 = smov %s667_s16 }
 0x152   : > { %s945_s16 = smov %s947_s28  ;;  %19 = sbr.rel (!%p17_p5) target bundleno = 7 (0x7), region = 81 }
 0x159   :  { %338 = vsyncpa [#allocation3], 1 }
 0x15a   :  { %340 = vsyncpa [#allocation3 + $0x1], 1 }
 0x15b   :  { %341 = vsyncpa [#allocation6], 1 }
 0x15c   :  { %342 = vsyncpa [#allocation4], 1 }
 0x15d   :  { %344 = vsyncpa [#allocation4 + $0x1], 1 }

</bundles_post_ra>
